<compile_context>
chip_gen: v6e
topology: v6e:2x2x1
jax: 0.10.0
libtpu: 0.0.40
codegen_flags: <defaults>
</compile_context>

<pallas_src>
import jax
import jax.numpy as jnp
from jax.experimental import pallas as pl
from jax.experimental.pallas import tpu as pltpu

LANE = 128
MAX_TM = 512          # acc is tm*E*4 = 1 MiB at tm=512/E=512 -> trivially fits


def _round_up(x: int, m: int) -> int:
    return ((x + m - 1) // m) * m


def _choose_tm(batch: int) -> int:
    # Multiple of 16 (bf16 sublane packing); prefer a single M tile so the
    # encoder weight streams from HBM exactly once.
    b16 = _round_up(max(int(batch), 1), 16)
    return b16 if b16 <= MAX_TM else 256


def _choose_k_layout(feat: int):
    """Return (tk, d_pad, split) with d_pad == split * nk * tk."""
    feat = max(int(feat), 1)
    if feat <= 3072:
        # Small feature dim: one K step, no cross-core split of the reduction.
        tk = _round_up(feat, LANE)
        return tk, tk, 1
    # Prefer a large K tile such that 2*tk divides feat exactly: the reduction
    # can then be split across two TensorCores with zero padding of x.
    for cand in (3072, 2048, 1536, 1024, 512):
        if feat % (2 * cand) == 0:
            return cand, feat, 2
    for cand in (3072, 2048, 1536, 1024, 512):
        if feat % cand == 0:
            return cand, feat, 1
    # Fallback: pad the feature dim (zero features contribute nothing).
    tk = 1536
    return tk, _round_up(feat, 2 * tk), 2


# ---------------------------------------------------------------------------
# Stage 1: K-tiled encoder projection, reduction split across a parallel axis.
# grid = (split, m_tiles, nk); out = partial embeddings [split, B_pad, E] f32.
# ---------------------------------------------------------------------------
def _encode_kernel(x_ref, we_ref, part_ref, acc_ref):
    k = pl.program_id(2)

    @pl.when(k == 0)
    def _init():
        acc_ref[...] = jnp.zeros_like(acc_ref)

    # Stand-in encode_image: streaming K-tiled projection on the MXU.
    # x is cast to bf16 in-kernel (avoids a separate wrapper-side cast pass).
    acc_ref[...] += jnp.dot(
        x_ref[...].astype(jnp.bfloat16),
        we_ref[...],
        preferred_element_type=jnp.float32,
    )

    @pl.when(k == pl.num_programs(2) - 1)
    def _finalize():
        part_ref[0] = acc_ref[...]


# ---------------------------------------------------------------------------
# Stage 2: combine K-split partials, half-precision round (CLIP encoder output
# dtype) + `.float()`, fused nn.Linear head. Lane-dense N_pad output.
# ---------------------------------------------------------------------------
def _head_kernel(part_ref, wt_ref, b_ref, o_ref):
    emb = jnp.sum(part_ref[...], axis=0).astype(jnp.bfloat16)
    o_ref[...] = (
        jnp.dot(emb, wt_ref[...], preferred_element_type=jnp.float32)
        + b_ref[...]
    )


# ---------------------------------------------------------------------------
# Wrapper
# ---------------------------------------------------------------------------
def clip_classifier_forward(images, params):
    """Equivalent of CLIPClassifier.forward(images) -> logits [B, num_classes]."""
    B = images.shape[0]
    w_enc = params["w_enc_pad"]        # [D_pad, E]   bf16 (frozen)
    w_t = params["w_t_pad"]            # [E, N_pad]   bf16
    bias = params["b_pad"]             # [1, N_pad]   f32
    D = params["in_features"]
    num_classes = params["num_classes"]
    tk = params["tk"]
    D_pad = params["d_pad"]
    split = params["split"]

    E = w_enc.shape[1]
    N_pad = w_t.shape[1]
    nk = D_pad // (split * tk)

    tm = _choose_tm(B)
    B_pad = _round_up(B, tm)
    m_tiles = B_pad // tm

    # Flatten NCHW -> [B, D]; frozen encoder path (`torch.no_grad`) -> stop
    # gradients. No dtype cast here: x streams at native width and is cast to
    # bf16 inside the kernel. Padding only happens if shapes require it (for
    # CLIP sizes tk divides D, so only a tiny row pad for odd batches).
    x = jax.lax.stop_gradient(images).reshape(B, -1)
    if x.dtype != jnp.bfloat16 and x.dtype != jnp.float32:
        x = x.astype(jnp.float32)
    if B_pad != B or D_pad != D:
        x = jnp.pad(x, ((0, B_pad - B), (0, D_pad - D)))
    x_bytes = x.dtype.itemsize

    # --- Stage 1: encoder projection ---------------------------------------
    cost1 = pl.CostEstimate(
        flops=2 * B_pad * D_pad * E,
        transcendentals=0,
        bytes_accessed=(
            B_pad * D_pad * x_bytes            # x streamed once
            + m_tiles * D_pad * E * 2          # w_enc re-streamed per M tile
            + split * B_pad * E * 4            # partial embeddings out
        ),
    )
    vmem_need = (
        2 * tm * tk * x_bytes                  # x tile, double-buffered
        + 2 * tk * E * 2                       # w_enc tile, double-buffered
        + 2 * tm * E * 4                       # partial-out tile, double-buffered
        + tm * E * 4                           # f32 accumulator scratch
    )
    vmem_limit = int(min(max(vmem_need + vmem_need // 2, 32 << 20), 48 << 20))

    partials = pl.pallas_call(
        _encode_kernel,
        out_shape=jax.ShapeDtypeStruct((split, B_pad, E), jnp.float32),
        grid_spec=pltpu.PrefetchScalarGridSpec(
            num_scalar_prefetch=0,
            grid=(split, m_tiles, nk),
            in_specs=[
                pl.BlockSpec((tm, tk), lambda s, i, k: (i, s * nk + k)),
                pl.BlockSpec((tk, E), lambda s, i, k: (s * nk + k, 0)),
            ],
            out_specs=pl.BlockSpec((1, tm, E), lambda s, i, k: (s, i, 0)),
            scratch_shapes=[pltpu.VMEM((tm, E), jnp.float32)],
        ),
        compiler_params=pltpu.CompilerParams(
            dimension_semantics=("parallel", "parallel", "arbitrary"),
            vmem_limit_bytes=vmem_limit,
        ),
        cost_estimate=cost1,
    )(x, w_enc)

    # --- Stage 2: combine + classifier head ---------------------------------
    cost2 = pl.CostEstimate(
        flops=2 * B_pad * E * N_pad + split * B_pad * E,
        transcendentals=0,
        bytes_accessed=(
            split * B_pad * E * 4 + E * N_pad * 2 + N_pad * 4
            + B_pad * N_pad * 4
        ),
    )
    logits_pad = pl.pallas_call(
        _head_kernel,
        out_shape=jax.ShapeDtypeStruct((B_pad, N_pad), jnp.float32),
        grid_spec=pltpu.PrefetchScalarGridSpec(
            num_scalar_prefetch=0,
            grid=(m_tiles,),
            in_specs=[
                pl.BlockSpec((split, tm, E), lambda i: (0, i, 0)),
                pl.BlockSpec((E, N_pad), lambda i: (0, 0)),
                pl.BlockSpec((1, N_pad), lambda i: (0, 0)),
            ],
            out_specs=pl.BlockSpec((tm, N_pad), lambda i: (i, 0)),
        ),
        compiler_params=pltpu.CompilerParams(
            dimension_semantics=("arbitrary",),
        ),
        cost_estimate=cost2,
    )(partials, w_t, bias)

    return logits_pad[:B, :num_classes]


# ---------------------------------------------------------------------------
# Deterministic parameter init + one-time layout prep (hoisted off hot path)
# ---------------------------------------------------------------------------
def init_params(key, in_features, embed_dim=512, num_classes=2):
    k_enc, k_w, k_b = jax.random.split(key, 3)
    # Stand-in encoder projection weight (frozen, half precision like CLIP).
    w_enc = (
        jax.random.normal(k_enc, (in_features, embed_dim), jnp.float32)
        * (1.0 / jnp.sqrt(in_features))
    ).astype(jnp.bfloat16)
    # nn.Linear(embed_dim, num_classes): weight [N, E], bias [N].
    bound = 1.0 / jnp.sqrt(embed_dim)
    w_cls = jax.random.uniform(
        k_w, (num_classes, embed_dim), jnp.float32, -bound, bound
    )
    b_cls = jax.random.uniform(k_b, (num_classes,), jnp.float32, -bound, bound)
    return {"w_enc": w_enc, "w_cls": w_cls, "b_cls": b_cls}


def prepare_params(raw):
    """One-time pad/transpose/cast so no layout ops run per forward."""
    w_enc = raw["w_enc"]                     # [D, E] bf16
    w_cls = raw["w_cls"]                     # [N, E] f32 (nn.Linear layout)
    b_cls = raw["b_cls"]                     # [N]    f32
    D, _ = w_enc.shape
    N = w_cls.shape[0]

    tk, d_pad, split = _choose_k_layout(D)
    n_pad = _round_up(N, LANE)               # lane-dense classifier output

    w_enc_pad = w_enc if d_pad == D else jnp.pad(w_enc, ((0, d_pad - D), (0, 0)))
    # Head weights in bf16: bf16 x bf16 MXU fast path with f32 accumulation.
    w_t_pad = jnp.pad(
        jnp.transpose(w_cls), ((0, 0), (0, n_pad - N))
    ).astype(jnp.bfloat16)
    b_pad = jnp.pad(b_cls, (0, n_pad - N)).reshape(1, n_pad)
    return {
        "w_enc_pad": w_enc_pad,
        "w_t_pad": w_t_pad,
        "b_pad": b_pad,
        "in_features": D,
        "num_classes": N,
        "tk": tk,
        "d_pad": d_pad,
        "split": split,
    }


if __name__ == "__main__":
    EMBED_DIM, NUM_CLASSES = 512, 2

    def run_case(case_key, B, C, H, W):
        k_img, k_params = jax.random.split(case_key)
        images = jax.random.normal(k_img, (B, C, H, W), jnp.float32)
        raw = init_params(k_params, C * H * W, EMBED_DIM, NUM_CLASSES)
        params = prepare_params(raw)

        logits = clip_classifier_forward(images, params)
        jax.block_until_ready(logits)
        assert logits.shape == (B, NUM_CLASSES) and logits.dtype == jnp.float32

        # Cross-check against plain-JAX reference (un-fused, un-padded).
        x_ref = images.reshape(B, -1).astype(jnp.bfloat16)
        emb = jnp.dot(x_ref, raw["w_enc"], preferred_element_type=jnp.float32)
        emb = emb.astype(jnp.bfloat16).astype(jnp.float32)
        ref = emb @ raw["w_cls"].T + raw["b_cls"]
        err = float(jnp.max(jnp.abs(logits - ref)))
        assert jnp.allclose(logits, ref, atol=2e-2, rtol=2e-2), err

    key = jax.random.PRNGKey(0)
    k1, k2 = jax.random.split(key)
    # Small shapes per the module spec (D=1024 -> single K step, split=1).
    run_case(k1, 2, 4, 16, 16)
    # Slightly larger feature dim to exercise the big-K-tile, K-split path
    # (D=6144 -> tk=3072, split=2).
    run_case(k2, 4, 6, 32, 32)

    print("KERNEL_OK")
</pallas_src>

<mosaic_0001>
module attributes {stable_mosaic.version = 11 : i64} {
  func.func @_encode_kernel(%arg0: i32, %arg1: i32, %arg2: i32, %arg3: memref<16x1024xf32, #tpu.memory_space<vmem>>, %arg4: memref<1024x512xbf16, #tpu.memory_space<vmem>>, %arg5: memref<1x16x512xf32, #tpu.memory_space<vmem>>, %arg6: memref<16x512xf32, #tpu.memory_space<vmem>>) attributes {dimension_semantics = [#tpu.dimension_semantics<parallel>, #tpu.dimension_semantics<parallel>, #tpu.dimension_semantics<arbitrary>], iteration_bounds = array<i64: 1, 1, 1>, scalar_prefetch = 0 : i64, scratch_operands = 1 : i64, tpu.core_type = #tpu.core_type<tc>, window_params = [{transform_indices = @transform_0, window_bounds = array<i64: 16, 1024>}, {transform_indices = @transform_1, window_bounds = array<i64: 1024, 512>}, {transform_indices = @transform_2, window_bounds = array<i64: 1, 16, 512>}]} {
    %c0_i32 = arith.constant 0 : i32
    %0 = arith.cmpi eq, %arg2, %c0_i32 : i32
    %1 = arith.extui %0 : i1 to i32
    %c0_i32_0 = arith.constant 0 : i32
    %2 = arith.cmpi ne, %1, %c0_i32_0 : i32
    scf.if %2 {
      %cst_10 = arith.constant 0.000000e+00 : f32
      %13 = vector.broadcast %cst_10 : f32 to vector<16x512xf32>
      %c0_11 = arith.constant 0 : index
      %c0_12 = arith.constant 0 : index
      %14 = vector.load %arg6[%c0_11, %c0_12] : memref<16x512xf32, #tpu.memory_space<vmem>>, vector<16x512xf32>
      tpu.vector_store %arg6[%c0_11, %c0_12], %13 {strides = array<i32>} : memref<16x512xf32, #tpu.memory_space<vmem>>, vector<16x512xf32>,
    } else {
    }
    %c0 = arith.constant 0 : index
    %c0_1 = arith.constant 0 : index
    %3 = vector.load %arg6[%c0, %c0_1] : memref<16x512xf32, #tpu.memory_space<vmem>>, vector<16x512xf32>
    %c0_2 = arith.constant 0 : index
    %c0_3 = arith.constant 0 : index
    %4 = vector.load %arg3[%c0_2, %c0_3] : memref<16x1024xf32, #tpu.memory_space<vmem>>, vector<16x1024xf32>
    %5 = arith.truncf %4 : vector<16x1024xf32> to vector<16x1024xbf16>
    %c0_4 = arith.constant 0 : index
    %c0_5 = arith.constant 0 : index
    %6 = vector.load %arg4[%c0_4, %c0_5] : memref<1024x512xbf16, #tpu.memory_space<vmem>>, vector<1024x512xbf16>
    %cst = arith.constant dense<0.000000e+00> : vector<16x512xf32>
    %7 = tpu.matmul %5, %6, %cst {dimension_numbers = #tpu.dot_dimension_numbers<[1], [0], [0], [1], [0, 0, 1, 1], [], []>} : vector<16x1024xbf16>, vector<1024x512xbf16>, vector<16x512xf32> -> vector<16x512xf32>
    %8 = arith.addf %3, %7 : vector<16x512xf32>
    %c0_6 = arith.constant 0 : index
    %c0_7 = arith.constant 0 : index
    %9 = vector.load %arg6[%c0_6, %c0_7] : memref<16x512xf32, #tpu.memory_space<vmem>>, vector<16x512xf32>
    tpu.vector_store %arg6[%c0_6, %c0_7], %8 {strides = array<i32>} : memref<16x512xf32, #tpu.memory_space<vmem>>, vector<16x512xf32>,
    %c0_i32_8 = arith.constant 0 : i32
    %10 = arith.cmpi eq, %arg2, %c0_i32_8 : i32
    %11 = arith.extui %10 : i1 to i32
    %c0_i32_9 = arith.constant 0 : i32
    %12 = arith.cmpi ne, %11, %c0_i32_9 : i32
    scf.if %12 {
      %c0_10 = arith.constant 0 : index
      %c0_11 = arith.constant 0 : index
      %13 = vector.load %arg6[%c0_10, %c0_11] : memref<16x512xf32, #tpu.memory_space<vmem>>, vector<16x512xf32>
      %c0_12 = arith.constant 0 : index
      %c0_13 = arith.constant 0 : index
      %c0_14 = arith.constant 0 : index
      %14 = vector.load %arg5[%c0_12, %c0_13, %c0_14] : memref<1x16x512xf32, #tpu.memory_space<vmem>>, vector<1x16x512xf32>
      %15 = vector.shape_cast %14 : vector<1x16x512xf32> to vector<16x512xf32>
      %16 = vector.shape_cast %13 : vector<16x512xf32> to vector<1x16x512xf32>
      tpu.vector_store %arg5[%c0_12, %c0_13, %c0_14], %16 {strides = array<i32>} : memref<1x16x512xf32, #tpu.memory_space<vmem>>, vector<1x16x512xf32>,
    } else {
    }
    return
  }
  func.func @transform_0(%arg0: i32, %arg1: i32, %arg2: i32) -> (i32, i32) {
    %c1_i32 = arith.constant 1 : i32
    %0 = arith.muli %arg0, %c1_i32 : i32
    %1 = arith.addi %0, %arg2 : i32
    %c0_i32 = arith.constant 0 : i32
    return %arg1, %1 : i32, i32
  }
  func.func @transform_1(%arg0: i32, %arg1: i32, %arg2: i32) -> (i32, i32) {
    %c1_i32 = arith.constant 1 : i32
    %0 = arith.muli %arg0, %c1_i32 : i32
    %1 = arith.addi %0, %arg2 : i32
    %c0_i32 = arith.constant 0 : i32
    %c0_i32_0 = arith.constant 0 : i32
    return %1, %c0_i32 : i32, i32
  }
  func.func @transform_2(%arg0: i32, %arg1: i32, %arg2: i32) -> (i32, i32, i32) {
    %c0_i32 = arith.constant 0 : i32
    %c0_i32_0 = arith.constant 0 : i32
    return %arg0, %arg1, %c0_i32 : i32, i32, i32
  }
}

</mosaic_0001>

<bundles_post_ra>
// kernel: tpu_custom_call.1
= control target key start
LH: loop header
LB: loop body
LE: loop exit
PB: predicated region body
PF: predicated region fallthrough
CT: control target
= control target key end

     0   :  { %7 = vsyncpa [#allocation4], 0  ;;  %s2810_s0 = inlined_call_operand.hbm [shape: f32[16,1024], index: 0, kind: input, shape index: {}]   ;;  %s2811_s1 = inlined_call_operand.hbm [shape: bf16[1024,512], index: 1, kind: input, shape index: {}]   ;;  %s2812_s2 = inlined_call_operand.hbm [shape: f32[1,16,512], index: 2, kind: output, shape index: {}]  }
   0x1   :  { %8 = vsyncpa [#allocation7], 0 }
   0x2   :  { %9 = vsyncpa [#allocation5], 0  ;;  %s2745_s9 = smov [#allocation3]  }
   0x3   :  { %s19_s10 = sshll.u32 %s2745_s9, 4  ;;  %s20_s10 = int_to_ptr.vmem [resolvable:$true] %s19_s10 }
   0x4   :  { %s2687_s11 = scalar_lea.vmem %s20_s10, 2048  ;;  %p2692_p1 = scmp.lt.s32.totalorder %s20_s10, %s20_s10 }
   0x5   :  { %p2688_p0 = scmp.ne.s32.totalorder %s20_s10, %s2687_s11  ;;  %p2693_p2 = scmp.lt.s32.totalorder %s2687_s11, %s2687_s11 }
   0x7   :  { %p2694_p3 = por %p2693_p2, %p2692_p1 }
   0x9   :  { %p2695_p4 = pnand %p2694_p3, %p2688_p0 }
   0xb   :  { %2698 = shalt.err (!%p2695_p4)
}
   0xc   :  { %s2746_s12 = smov 1024   ;;  %s2747_s13 = smov 64  }
   0xd   :  { %25 = dma.hbm_to_vmem [thread:$0]  %s2810_s0, 2048, %s20_s10, [#allocation4], %s2746_s12, %s2746_s12, %s2747_s13  }
   0xe   :  { %s2748_s16 = smov [#allocation6]  }
   0xf   :  { %s36_s17 = sshll.u32 %s2748_s16, 4  ;;  %s37_s17 = int_to_ptr.vmem [resolvable:$true] %s36_s17 }
  0x10   :  { %s2707_s18 = scalar_lea.vmem %s37_s17, 32768  ;;  %p2712_p6 = scmp.lt.s32.totalorder %s37_s17, %s37_s17 }
  0x11   :  { %p2708_p5 = scmp.ne.s32.totalorder %s37_s17, %s2707_s18  ;;  %p2713_p7 = scmp.lt.s32.totalorder %s2707_s18, %s2707_s18 }
  0x13   :  { %p2714_p8 = por %p2713_p7, %p2712_p6 }
  0x15   :  { %p2715_p9 = pnand %p2714_p8, %p2708_p5 }
  0x17   :  { %2718 = shalt.err (!%p2715_p9)
}
  0x18   :  { %s2749_s19 = smov 256   ;;  %s2750_s20 = smov 16  }
  0x19   :  { %42 = dma.hbm_to_vmem [thread:$0]  %s2811_s1, 32768, %s37_s17, [#allocation7], %s2749_s19, %s2749_s19, %s2750_s20  }
  0x1a   :  { %2739 = dma.done.wait [#allocation4], 2048  }
  0x1b   :  { %2740 = vsyncadd [#allocation4], 4294965248 }
  0x1c   :  { %2741 = dma.done.wait [#allocation7], 32768  }
  0x1d   :  { %2742 = vsyncadd [#allocation7], 4294934528  ;;  %v2295_v0 = vld [vmem:[#allocation6 + $0xe4] ss:$16 sps:$4 sm:$0xff]   ;;  %v2299_v2 = vld [vmem:[#allocation6 + $0xe0] ss:$16 sps:$4 sm:$0xff]  }
  0x1e   :  { %v2297_v1 = vld [vmem:[#allocation6 + $0x2e4] ss:$16 sps:$4 sm:$0xff]   ;;  %1633 = vmatprep.subr.bf16.mxu0 %v2295_v0  ;;  %v2300_v3 = vld [vmem:[#allocation6 + $0x2e0] ss:$16 sps:$4 sm:$0xff]   ;;  %v74_v46 = vld [vmem:[#allocation3 + $0x8] sm:$0xff]  ;;  %s2751_s0 = smov [#allocation8]  }
  0x1f   :  { %1676 = vmatprep.subr.bf16.mxu1 %v2297_v1  ;;  %v2301_v4 = vld [vmem:[#allocation6 + $0xc4] ss:$16 sps:$4 sm:$0xff]   ;;  %1634 = vmatpush1.bf16.msra.mxu0 %v2299_v2  ;;  %v2305_v6 = vld [vmem:[#allocation6 + $0xc0] ss:$16 sps:$4 sm:$0xff]   ;;  %v82_v47 = vld [vmem:[#allocation3 + $0x48] sm:$0xff]  ;;  %s2017_s1 = sshll.u32 %s2751_s0, 4  ;;  %s2018_s1 = int_to_ptr.vmem [resolvable:$true] %s2017_s1 }
  0x20   :  { %1677 = vmatpush1.bf16.msra.mxu1 %v2300_v3  ;;  %v2303_v5 = vld [vmem:[#allocation6 + $0x2c4] ss:$16 sps:$4 sm:$0xff]   ;;  %1635 = vmatprep.subr.bf16.mxu0 %v2301_v4  ;;  %v2306_v7 = vld [vmem:[#allocation6 + $0x2c0] ss:$16 sps:$4 sm:$0xff]   ;;  %v76_v48 = vld [vmem:[#allocation3 + $0x18] sm:$0xff]  ;;  %v2775_v53 = vpack.c.bf16 %v82_v47, %v74_v46  ;;  %s2719_s23 = scalar_lea.vmem %s2018_s1, 1024  ;;  %p2724_p11 = scmp.lt.s32.totalorder %s2018_s1, %s2018_s1 }
  0x21   :  { %1678 = vmatprep.subr.bf16.mxu1 %v2303_v5  ;;  %v2307_v8 = vld [vmem:[#allocation6 + $0xa4] ss:$16 sps:$4 sm:$0xff]   ;;  %v2311_v10 = vld [vmem:[#allocation6 + $0xa0] ss:$16 sps:$4 sm:$0xff]   ;;  %v84_v49 = vld [vmem:[#allocation3 + $0x58] sm:$0xff]  ;;  %p2720_p10 = scmp.ne.s32.totalorder %s2018_s1, %s2719_s23  ;;  %p2725_p12 = scmp.lt.s32.totalorder %s2719_s23, %s2719_s23 }
  0x22   :  { %v2309_v9 = vld [vmem:[#allocation6 + $0x2a4] ss:$16 sps:$4 sm:$0xff]   ;;  %v2312_v11 = vld [vmem:[#allocation6 + $0x2a0] ss:$16 sps:$4 sm:$0xff]   ;;  %v2777_v54 = vpack.c.bf16 %v84_v49, %v76_v48  ;;  %1665 = vmatprep.mubr.bf16.mxu0 %v2775_v53  ;;  %v88_v46 = vld [vmem:[#allocation3 + $0x78] sm:$0xff] }
  0x23   :  { %1636 = vmatpush1.bf16.msra.mxu0 %v2305_v6  ;;  %v2313_v12 = vld [vmem:[#allocation6 + $0x84] ss:$16 sps:$4 sm:$0xff]   ;;  %v2317_v14 = vld [vmem:[#allocation6 + $0x80] ss:$16 sps:$4 sm:$0xff]   ;;  %p2726_p13 = por %p2725_p12, %p2724_p11 }
  0x24   :  { %1679 = vmatpush1.bf16.msra.mxu1 %v2306_v7  ;;  %1637 = vmatprep.subr.bf16.mxu0 %v2307_v8  ;;  %v2315_v13 = vld [vmem:[#allocation6 + $0x284] ss:$16 sps:$4 sm:$0xff]   ;;  %v2318_v15 = vld [vmem:[#allocation6 + $0x280] ss:$16 sps:$4 sm:$0xff]  }
  0x25   :  { %1680 = vmatprep.subr.bf16.mxu1 %v2309_v9  ;;  %v2319_v16 = vld [vmem:[#allocation6 + $0x64] ss:$16 sps:$4 sm:$0xff]   ;;  %v2323_v18 = vld [vmem:[#allocation6 + $0x60] ss:$16 sps:$4 sm:$0xff]   ;;  %1708 = vmatprep.mubr.bf16.mxu1 %v2777_v54  ;;  %p2727_p0 = pnand %p2726_p13, %p2720_p10 }
  0x26   :  { %v2321_v17 = vld [vmem:[#allocation6 + $0x264] ss:$16 sps:$4 sm:$0xff]   ;;  %v2324_v19 = vld [vmem:[#allocation6 + $0x260] ss:$16 sps:$4 sm:$0xff]  }
  0x27   :  { %1638 = vmatpush1.bf16.msra.mxu0 %v2311_v10  ;;  %v2325_v20 = vld [vmem:[#allocation6 + $0x44] ss:$16 sps:$4 sm:$0xff]   ;;  %v2329_v22 = vld [vmem:[#allocation6 + $0x40] ss:$16 sps:$4 sm:$0xff]  }
  0x28   :  { %1681 = vmatpush1.bf16.msra.mxu1 %v2312_v11  ;;  %1639 = vmatprep.subr.bf16.mxu0 %v2313_v12  ;;  %v2327_v21 = vld [vmem:[#allocation6 + $0x244] ss:$16 sps:$4 sm:$0xff]   ;;  %v2330_v23 = vld [vmem:[#allocation6 + $0x240] ss:$16 sps:$4 sm:$0xff]  }
  0x29   :  { %1682 = vmatprep.subr.bf16.mxu1 %v2315_v13  ;;  %v2331_v24 = vld [vmem:[#allocation6 + $0x24] ss:$16 sps:$4 sm:$0xff]   ;;  %v2335_v26 = vld [vmem:[#allocation6 + $0x20] ss:$16 sps:$4 sm:$0xff]  }
  0x2a   :  { %v2333_v25 = vld [vmem:[#allocation6 + $0x224] ss:$16 sps:$4 sm:$0xff]   ;;  %v2336_v27 = vld [vmem:[#allocation6 + $0x220] ss:$16 sps:$4 sm:$0xff]  }
  0x2b   :  { %1640 = vmatpush1.bf16.msra.mxu0 %v2317_v14  ;;  %v2337_v28 = vld [vmem:[#allocation6 + $0x4] ss:$16 sps:$4 sm:$0xff]   ;;  %v2341_v30 = vld [vmem:[#allocation6] ss:$16 sps:$4 sm:$0xff]  }
  0x2c   :  { %1683 = vmatpush1.bf16.msra.mxu1 %v2318_v15  ;;  %1641 = vmatprep.subr.bf16.mxu0 %v2319_v16  ;;  %v2339_v29 = vld [vmem:[#allocation6 + $0x204] ss:$16 sps:$4 sm:$0xff]   ;;  %v2342_v31 = vld [vmem:[#allocation6 + $0x200] ss:$16 sps:$4 sm:$0xff]  }
  0x2d   :  { %1684 = vmatprep.subr.bf16.mxu1 %v2321_v17  ;;  %v2343_v32 = vld [vmem:[#allocation6 + $0x1e4] ss:$16 sps:$4 sm:$0xff]   ;;  %v2347_v34 = vld [vmem:[#allocation6 + $0x1e0] ss:$16 sps:$4 sm:$0xff]  }
  0x2e   :  { %v2345_v33 = vld [vmem:[#allocation6 + $0x3e4] ss:$16 sps:$4 sm:$0xff]   ;;  %v2348_v35 = vld [vmem:[#allocation6 + $0x3e0] ss:$16 sps:$4 sm:$0xff]  }
  0x2f   :  { %1642 = vmatpush1.bf16.msra.mxu0 %v2323_v18  ;;  %v2349_v36 = vld [vmem:[#allocation6 + $0x1c4] ss:$16 sps:$4 sm:$0xff]   ;;  %v2353_v38 = vld [vmem:[#allocation6 + $0x1c0] ss:$16 sps:$4 sm:$0xff]  }
  0x30   :  { %1685 = vmatpush1.bf16.msra.mxu1 %v2324_v19  ;;  %1643 = vmatprep.subr.bf16.mxu0 %v2325_v20  ;;  %v2351_v37 = vld [vmem:[#allocation6 + $0x3c4] ss:$16 sps:$4 sm:$0xff]   ;;  %v2354_v39 = vld [vmem:[#allocation6 + $0x3c0] ss:$16 sps:$4 sm:$0xff]  }
  0x31   :  { %1686 = vmatprep.subr.bf16.mxu1 %v2327_v21  ;;  %v2355_v40 = vld [vmem:[#allocation6 + $0x1a4] ss:$16 sps:$4 sm:$0xff]   ;;  %v2359_v42 = vld [vmem:[#allocation6 + $0x1a0] ss:$16 sps:$4 sm:$0xff]  }
  0x32   :  { %v2357_v41 = vld [vmem:[#allocation6 + $0x3a4] ss:$16 sps:$4 sm:$0xff]   ;;  %v2360_v43 = vld [vmem:[#allocation6 + $0x3a0] ss:$16 sps:$4 sm:$0xff]  }
  0x33   :  { %1644 = vmatpush1.bf16.msra.mxu0 %v2329_v22  ;;  %v2361_v44 = vld [vmem:[#allocation6 + $0x184] ss:$16 sps:$4 sm:$0xff]   ;;  %v2365_v50 = vld [vmem:[#allocation6 + $0x180] ss:$16 sps:$4 sm:$0xff]  }
  0x34   :  { %1687 = vmatpush1.bf16.msra.mxu1 %v2330_v23  ;;  %1645 = vmatprep.subr.bf16.mxu0 %v2331_v24  ;;  %v2363_v45 = vld [vmem:[#allocation6 + $0x384] ss:$16 sps:$4 sm:$0xff]   ;;  %v2366_v51 = vld [vmem:[#allocation6 + $0x380] ss:$16 sps:$4 sm:$0xff]  }
  0x35   :  { %1688 = vmatprep.subr.bf16.mxu1 %v2333_v25  ;;  %v2367_v52 = vld [vmem:[#allocation6 + $0x164] ss:$16 sps:$4 sm:$0xff]   ;;  %v2371_v56 = vld [vmem:[#allocation6 + $0x160] ss:$16 sps:$4 sm:$0xff]  }
  0x36   :  { %v2369_v55 = vld [vmem:[#allocation6 + $0x364] ss:$16 sps:$4 sm:$0xff]   ;;  %v2372_v57 = vld [vmem:[#allocation6 + $0x360] ss:$16 sps:$4 sm:$0xff]  }
  0x37   :  { %1646 = vmatpush1.bf16.msra.mxu0 %v2335_v26  ;;  %v2373_v58 = vld [vmem:[#allocation6 + $0x144] ss:$16 sps:$4 sm:$0xff]   ;;  %v2377_v60 = vld [vmem:[#allocation6 + $0x140] ss:$16 sps:$4 sm:$0xff]  }
  0x38   :  { %1689 = vmatpush1.bf16.msra.mxu1 %v2336_v27  ;;  %1647 = vmatprep.subr.bf16.mxu0 %v2337_v28  ;;  %v2375_v59 = vld [vmem:[#allocation6 + $0x344] ss:$16 sps:$4 sm:$0xff]   ;;  %v2378_v61 = vld [vmem:[#allocation6 + $0x340] ss:$16 sps:$4 sm:$0xff]  }
  0x39   :  { %1690 = vmatprep.subr.bf16.mxu1 %v2339_v29  ;;  %v2379_v62 = vld [vmem:[#allocation6 + $0x124] ss:$16 sps:$4 sm:$0xff]   ;;  %v2383_v0 = vld [vmem:[#allocation6 + $0x120] ss:$16 sps:$4 sm:$0xff]  }
  0x3a   :  { %v2381_v63 = vld [vmem:[#allocation6 + $0x324] ss:$16 sps:$4 sm:$0xff]   ;;  %v2384_v1 = vld [vmem:[#allocation6 + $0x320] ss:$16 sps:$4 sm:$0xff]  }
  0x3b   :  { %1648 = vmatpush1.bf16.msra.mxu0 %v2341_v30  ;;  %v2385_v2 = vld [vmem:[#allocation6 + $0x104] ss:$16 sps:$4 sm:$0xff]   ;;  %v2389_v4 = vld [vmem:[#allocation6 + $0x100] ss:$16 sps:$4 sm:$0xff]  }
  0x3c   :  { %1691 = vmatpush1.bf16.msra.mxu1 %v2342_v31  ;;  %1649 = vmatprep.subr.bf16.mxu0 %v2343_v32  ;;  %v2387_v3 = vld [vmem:[#allocation6 + $0x304] ss:$16 sps:$4 sm:$0xff]   ;;  %v2390_v5 = vld [vmem:[#allocation6 + $0x300] ss:$16 sps:$4 sm:$0xff]  }
  0x3d   :  { %1692 = vmatprep.subr.bf16.mxu1 %v2345_v33  ;;  %v73_v6 = vld [vmem:[#allocation3] sm:$0xff]  ;;  %v75_v8 = vld [vmem:[#allocation3 + $0x10] sm:$0xff] }
  0x3e   :  { %v81_v7 = vld [vmem:[#allocation3 + $0x40] sm:$0xff]  ;;  %v83_v9 = vld [vmem:[#allocation3 + $0x50] sm:$0xff] }
  0x3f   :  { %1650 = vmatpush2.bf16.msra.mxu0 %v2347_v34  ;;  %v2393_v10 = vld [vmem:[#allocation6 + $0x4e4] ss:$16 sps:$4 sm:$0xff]   ;;  %v2781_v12 = vpack.c.bf16 %v81_v7, %v73_v6  ;;  %v2783_v13 = vpack.c.bf16 %v83_v9, %v75_v8  ;;  %v2391_v14 = vld [vmem:[#allocation6 + $0x4e0] ss:$16 sps:$4 sm:$0xff]  }
  0x40   :  { %1693 = vmatpush2.bf16.msra.mxu1 %v2348_v35  ;;  %1651 = vmatprep.subr.bf16.mxu0 %v2349_v36  ;;  %v2396_v11 = vld [vmem:[#allocation6 + $0x6e4] ss:$16 sps:$4 sm:$0xff]   ;;  %v2394_v15 = vld [vmem:[#allocation6 + $0x6e0] ss:$16 sps:$4 sm:$0xff]  }
  0x41   :  { %1694 = vmatprep.subr.bf16.mxu1 %v2351_v37  ;;  %v2399_v16 = vld [vmem:[#allocation6 + $0x4c4] ss:$16 sps:$4 sm:$0xff]   ;;  %v2397_v18 = vld [vmem:[#allocation6 + $0x4c0] ss:$16 sps:$4 sm:$0xff]  }
  0x42   :  { %v2402_v17 = vld [vmem:[#allocation6 + $0x6c4] ss:$16 sps:$4 sm:$0xff]   ;;  %v2400_v19 = vld [vmem:[#allocation6 + $0x6c0] ss:$16 sps:$4 sm:$0xff]  }
  0x43   :  { %1652 = vmatpush2.bf16.msra.mxu0 %v2353_v38  ;;  %v2405_v20 = vld [vmem:[#allocation6 + $0x4a4] ss:$16 sps:$4 sm:$0xff]   ;;  %v2403_v22 = vld [vmem:[#allocation6 + $0x4a0] ss:$16 sps:$4 sm:$0xff]  }
  0x44   :  { %1695 = vmatpush2.bf16.msra.mxu1 %v2354_v39  ;;  %1653 = vmatprep.subr.bf16.mxu0 %v2355_v40  ;;  %v2408_v21 = vld [vmem:[#allocation6 + $0x6a4] ss:$16 sps:$4 sm:$0xff]   ;;  %v2406_v23 = vld [vmem:[#allocation6 + $0x6a0] ss:$16 sps:$4 sm:$0xff]   ;;  %v78_v40 = vld [vmem:[#allocation3 + $0x28] sm:$0xff] }
  0x45   :  { %1696 = vmatprep.subr.bf16.mxu1 %v2357_v41  ;;  %v2411_v24 = vld [vmem:[#allocation6 + $0x484] ss:$16 sps:$4 sm:$0xff]   ;;  %v2409_v26 = vld [vmem:[#allocation6 + $0x480] ss:$16 sps:$4 sm:$0xff]   ;;  %v86_v41 = vld [vmem:[#allocation3 + $0x68] sm:$0xff] }
  0x46   :  { %v2414_v25 = vld [vmem:[#allocation6 + $0x684] ss:$16 sps:$4 sm:$0xff]   ;;  %v2412_v27 = vld [vmem:[#allocation6 + $0x680] ss:$16 sps:$4 sm:$0xff]  }
  0x47   :  { %1654 = vmatpush2.bf16.msra.mxu0 %v2359_v42  ;;  %v2417_v28 = vld [vmem:[#allocation6 + $0x464] ss:$16 sps:$4 sm:$0xff]   ;;  %v2415_v30 = vld [vmem:[#allocation6 + $0x460] ss:$16 sps:$4 sm:$0xff]   ;;  %v80_v42 = vld [vmem:[#allocation3 + $0x38] sm:$0xff] }
  0x48   :  { %1697 = vmatpush2.bf16.msra.mxu1 %v2360_v43  ;;  %1655 = vmatprep.subr.bf16.mxu0 %v2361_v44  ;;  %v2420_v29 = vld [vmem:[#allocation6 + $0x664] ss:$16 sps:$4 sm:$0xff]   ;;  %v2418_v31 = vld [vmem:[#allocation6 + $0x660] ss:$16 sps:$4 sm:$0xff]   ;;  %v2789_v47 = vpack.c.bf16 %v88_v46, %v80_v42  ;;  %v2505_v42 = vld [vmem:[#allocation6 + $0x88] ss:$16 sps:$4 sm:$0xff]  }
  0x49   :  { %1698 = vmatprep.subr.bf16.mxu1 %v2363_v45  ;;  %v2423_v32 = vld [vmem:[#allocation6 + $0x444] ss:$16 sps:$4 sm:$0xff]   ;;  %v2421_v34 = vld [vmem:[#allocation6 + $0x440] ss:$16 sps:$4 sm:$0xff]   ;;  %v2787_v45 = vpack.c.bf16 %v86_v41, %v78_v40  ;;  %v2507_v40 = vld [vmem:[#allocation6 + $0x8c] ss:$16 sps:$4 sm:$0xff]  }
  0x4a   :  { %v2426_v33 = vld [vmem:[#allocation6 + $0x644] ss:$16 sps:$4 sm:$0xff]   ;;  %v2424_v35 = vld [vmem:[#allocation6 + $0x640] ss:$16 sps:$4 sm:$0xff]   ;;  %v2510_v41 = vld [vmem:[#allocation6 + $0x28c] ss:$16 sps:$4 sm:$0xff]  }
  0x4b   :  { %1656 = vmatpush2.bf16.msra.mxu0 %v2365_v50  ;;  %v2429_v36 = vld [vmem:[#allocation6 + $0x424] ss:$16 sps:$4 sm:$0xff]   ;;  %v2427_v38 = vld [vmem:[#allocation6 + $0x420] ss:$16 sps:$4 sm:$0xff]   ;;  %v2516_v46 = vld [vmem:[#allocation6 + $0x26c] ss:$16 sps:$4 sm:$0xff]  }
  0x4c   :  { %1699 = vmatpush2.bf16.msra.mxu1 %v2366_v51  ;;  %1657 = vmatprep.subr.bf16.mxu0 %v2367_v52  ;;  %v2432_v37 = vld [vmem:[#allocation6 + $0x624] ss:$16 sps:$4 sm:$0xff]   ;;  %v2430_v39 = vld [vmem:[#allocation6 + $0x620] ss:$16 sps:$4 sm:$0xff]  }
  0x4d   :  { %1700 = vmatprep.subr.bf16.mxu1 %v2369_v55  ;;  %v2435_v43 = vld [vmem:[#allocation6 + $0x404] ss:$16 sps:$4 sm:$0xff]   ;;  %v2433_v48 = vld [vmem:[#allocation6 + $0x400] ss:$16 sps:$4 sm:$0xff]  }
  0x4e   :  { %v2438_v44 = vld [vmem:[#allocation6 + $0x604] ss:$16 sps:$4 sm:$0xff]   ;;  %v2436_v49 = vld [vmem:[#allocation6 + $0x600] ss:$16 sps:$4 sm:$0xff]  }
  0x4f   :  { %1658 = vmatpush2.bf16.msra.mxu0 %v2371_v56  ;;  %v2441_v50 = vld [vmem:[#allocation6 + $0x5e4] ss:$16 sps:$4 sm:$0xff]   ;;  %v2439_v52 = vld [vmem:[#allocation6 + $0x5e0] ss:$16 sps:$4 sm:$0xff]  }
  0x50   :  { %1701 = vmatpush2.bf16.msra.mxu1 %v2372_v57  ;;  %1659 = vmatprep.subr.bf16.mxu0 %v2373_v58  ;;  %v2444_v51 = vld [vmem:[#allocation6 + $0x7e4] ss:$16 sps:$4 sm:$0xff]   ;;  %v2442_v55 = vld [vmem:[#allocation6 + $0x7e0] ss:$16 sps:$4 sm:$0xff]  }
  0x51   :  { %1702 = vmatprep.subr.bf16.mxu1 %v2375_v59  ;;  %v2447_v56 = vld [vmem:[#allocation6 + $0x5c4] ss:$16 sps:$4 sm:$0xff]   ;;  %v2445_v58 = vld [vmem:[#allocation6 + $0x5c0] ss:$16 sps:$4 sm:$0xff]  }
  0x52   :  { %v2450_v57 = vld [vmem:[#allocation6 + $0x7c4] ss:$16 sps:$4 sm:$0xff]   ;;  %v2448_v59 = vld [vmem:[#allocation6 + $0x7c0] ss:$16 sps:$4 sm:$0xff]  }
  0x53   :  { %1660 = vmatpush2.bf16.msra.mxu0 %v2377_v60  ;;  %v2453_v60 = vld [vmem:[#allocation6 + $0x5a4] ss:$16 sps:$4 sm:$0xff]   ;;  %v2463_v6 = vld [vmem:[#allocation6 + $0x560] ss:$16 sps:$4 sm:$0xff]  }
  0x54   :  { %1703 = vmatpush2.bf16.msra.mxu1 %v2378_v61  ;;  %1661 = vmatprep.subr.bf16.mxu0 %v2379_v62  ;;  %v2456_v61 = vld [vmem:[#allocation6 + $0x7a4] ss:$16 sps:$4 sm:$0xff]   ;;  %v2451_v62 = vld [vmem:[#allocation6 + $0x5a0] ss:$16 sps:$4 sm:$0xff]  }
  0x55   :  { %1704 = vmatprep.subr.bf16.mxu1 %v2381_v63  ;;  %v2454_v63 = vld [vmem:[#allocation6 + $0x7a0] ss:$16 sps:$4 sm:$0xff]   ;;  %v2471_v8 = vld [vmem:[#allocation6 + $0x544] ss:$16 sps:$4 sm:$0xff]  }
  0x56   :  { %v2466_v7 = vld [vmem:[#allocation6 + $0x760] ss:$16 sps:$4 sm:$0xff]   ;;  %v2474_v9 = vld [vmem:[#allocation6 + $0x744] ss:$16 sps:$4 sm:$0xff]  }
  0x57   :  { %1662 = vmatpush2.bf16.msra.mxu0 %v2383_v0  ;;  %v2459_v0 = vld [vmem:[#allocation6 + $0x584] ss:$16 sps:$4 sm:$0xff]  }
  0x58   :  { %1705 = vmatpush2.bf16.msra.mxu1 %v2384_v1  ;;  %1663 = vmatprep.subr.bf16.mxu0 %v2385_v2  ;;  %v2462_v1 = vld [vmem:[#allocation6 + $0x784] ss:$16 sps:$4 sm:$0xff]   ;;  %v2457_v2 = vld [vmem:[#allocation6 + $0x580] ss:$16 sps:$4 sm:$0xff]  }
  0x59   :  { %1706 = vmatprep.subr.bf16.mxu1 %v2387_v3  ;;  %v2460_v3 = vld [vmem:[#allocation6 + $0x780] ss:$16 sps:$4 sm:$0xff]  }
  0x5b   :  { %1664 = vmatpush2.bf16.msra.mxu0 %v2389_v4  ;;  %v2465_v4 = vld [vmem:[#allocation6 + $0x564] ss:$16 sps:$4 sm:$0xff]  }
  0x5c   :  { %1707 = vmatpush2.bf16.msra.mxu1 %v2390_v5  ;;  %1719 = vmatprep.subr.bf16.mxu0 %v2393_v10  ;;  %v2468_v5 = vld [vmem:[#allocation6 + $0x764] ss:$16 sps:$4 sm:$0xff]   ;;  %v2469_v10 = vld [vmem:[#allocation6 + $0x540] ss:$16 sps:$4 sm:$0xff]  }
  0x5d   :  { %1762 = vmatprep.subr.bf16.mxu1 %v2396_v11  ;;  %v2472_v11 = vld [vmem:[#allocation6 + $0x740] ss:$16 sps:$4 sm:$0xff]  }
  0x5e   :  { %1666 = vmatmul.mubr.bf16.vlgmr.msra.gmra.mxu0 %v2781_v12 }
  0x5f   :  { %1709 = vmatmul.mubr.bf16.vlgmr.msra.gmra.mxu1 %v2783_v13  ;;  %1720 = vmatpush1.bf16.msra.mxu0 %v2391_v14  ;;  %v2477_v14 = vld [vmem:[#allocation6 + $0x524] ss:$16 sps:$4 sm:$0xff]  }
  0x60   :  { %1763 = vmatpush1.bf16.msra.mxu1 %v2394_v15  ;;  %1721 = vmatprep.subr.bf16.mxu0 %v2399_v16  ;;  %v2480_v15 = vld [vmem:[#allocation6 + $0x724] ss:$16 sps:$4 sm:$0xff]   ;;  %v2475_v16 = vld [vmem:[#allocation6 + $0x520] ss:$16 sps:$4 sm:$0xff]  }
  0x61   :  { %1764 = vmatprep.subr.bf16.mxu1 %v2402_v17  ;;  %1751 = vmatprep.mubr.bf16.mxu0 %v2787_v45  ;;  %v2478_v17 = vld [vmem:[#allocation6 + $0x720] ss:$16 sps:$4 sm:$0xff]  }
  0x62   :  { %1794 = vmatprep.mubr.bf16.mxu1 %v2789_v47 }
  0x63   :  { %1722 = vmatpush1.bf16.msra.mxu0 %v2397_v18  ;;  %v2483_v18 = vld [vmem:[#allocation6 + $0x504] ss:$16 sps:$4 sm:$0xff]  }
  0x64   :  { %1765 = vmatpush1.bf16.msra.mxu1 %v2400_v19  ;;  %1723 = vmatprep.subr.bf16.mxu0 %v2405_v20  ;;  %v2486_v19 = vld [vmem:[#allocation6 + $0x704] ss:$16 sps:$4 sm:$0xff]   ;;  %v2481_v20 = vld [vmem:[#allocation6 + $0x500] ss:$16 sps:$4 sm:$0xff]  }
  0x65   :  { %1766 = vmatprep.subr.bf16.mxu1 %v2408_v21  ;;  %v2484_v21 = vld [vmem:[#allocation6 + $0x700] ss:$16 sps:$4 sm:$0xff]  }
  0x67   :  { %1724 = vmatpush1.bf16.msra.mxu0 %v2403_v22  ;;  %v77_v22 = vld [vmem:[#allocation3 + $0x20] sm:$0xff] }
  0x68   :  { %1767 = vmatpush1.bf16.msra.mxu1 %v2406_v23  ;;  %1725 = vmatprep.subr.bf16.mxu0 %v2411_v24  ;;  %v85_v23 = vld [vmem:[#allocation3 + $0x60] sm:$0xff]  ;;  %v79_v24 = vld [vmem:[#allocation3 + $0x30] sm:$0xff] }
  0x69   :  { %1768 = vmatprep.subr.bf16.mxu1 %v2414_v25  ;;  %v87_v25 = vld [vmem:[#allocation3 + $0x70] sm:$0xff] }
  0x6b   :  { %1726 = vmatpush1.bf16.msra.mxu0 %v2409_v26  ;;  %v2489_v26 = vld [vmem:[#allocation6 + $0xec] ss:$16 sps:$4 sm:$0xff]  }
  0x6c   :  { %1769 = vmatpush1.bf16.msra.mxu1 %v2412_v27  ;;  %1727 = vmatprep.subr.bf16.mxu0 %v2417_v28  ;;  %v2492_v27 = vld [vmem:[#allocation6 + $0x2ec] ss:$16 sps:$4 sm:$0xff]   ;;  %v2793_v28 = vpack.c.bf16 %v85_v23, %v77_v22  ;;  %v2565_v22 = vld [vmem:[#allocation6 + $0x148] ss:$16 sps:$4 sm:$0xff]  }
  0x6d   :  { %1770 = vmatprep.subr.bf16.mxu1 %v2420_v29  ;;  %v2795_v29 = vpack.c.bf16 %v87_v25, %v79_v24  ;;  %v2568_v23 = vld [vmem:[#allocation6 + $0x348] ss:$16 sps:$4 sm:$0xff]   ;;  %v2573_v24 = vld [vmem:[#allocation6 + $0x12c] ss:$16 sps:$4 sm:$0xff]  }
  0x6e   :  { %v2576_v25 = vld [vmem:[#allocation6 + $0x32c] ss:$16 sps:$4 sm:$0xff]  }
  0x6f   :  { %1728 = vmatpush1.bf16.msra.mxu0 %v2415_v30  ;;  %v2487_v30 = vld [vmem:[#allocation6 + $0xe8] ss:$16 sps:$4 sm:$0xff]  }
  0x70   :  { %1771 = vmatpush1.bf16.msra.mxu1 %v2418_v31  ;;  %1729 = vmatprep.subr.bf16.mxu0 %v2423_v32  ;;  %v2490_v31 = vld [vmem:[#allocation6 + $0x2e8] ss:$16 sps:$4 sm:$0xff]   ;;  %v2495_v32 = vld [vmem:[#allocation6 + $0xcc] ss:$16 sps:$4 sm:$0xff]  }
  0x71   :  { %1772 = vmatprep.subr.bf16.mxu1 %v2426_v33  ;;  %v2498_v33 = vld [vmem:[#allocation6 + $0x2cc] ss:$16 sps:$4 sm:$0xff]  }
  0x73   :  { %1730 = vmatpush1.bf16.msra.mxu0 %v2421_v34  ;;  %v2493_v34 = vld [vmem:[#allocation6 + $0xc8] ss:$16 sps:$4 sm:$0xff]  }
  0x74   :  { %1773 = vmatpush1.bf16.msra.mxu1 %v2424_v35  ;;  %1731 = vmatprep.subr.bf16.mxu0 %v2429_v36  ;;  %v2496_v35 = vld [vmem:[#allocation6 + $0x2c8] ss:$16 sps:$4 sm:$0xff]   ;;  %v2501_v36 = vld [vmem:[#allocation6 + $0xac] ss:$16 sps:$4 sm:$0xff]  }
  0x75   :  { %1774 = vmatprep.subr.bf16.mxu1 %v2432_v37  ;;  %v2504_v37 = vld [vmem:[#allocation6 + $0x2ac] ss:$16 sps:$4 sm:$0xff]  }
  0x77   :  { %1732 = vmatpush1.bf16.msra.mxu0 %v2427_v38  ;;  %v2499_v38 = vld [vmem:[#allocation6 + $0xa8] ss:$16 sps:$4 sm:$0xff]  }
  0x78   :  { %1775 = vmatpush1.bf16.msra.mxu1 %v2430_v39  ;;  %1733 = vmatprep.subr.bf16.mxu0 %v2435_v43  ;;  %v2502_v39 = vld [vmem:[#allocation6 + $0x2a8] ss:$16 sps:$4 sm:$0xff]  }
  0x79   :  { %1776 = vmatprep.subr.bf16.mxu1 %v2438_v44  ;;  %v2508_v43 = vld [vmem:[#allocation6 + $0x288] ss:$16 sps:$4 sm:$0xff]   ;;  %v2513_v44 = vld [vmem:[#allocation6 + $0x6c] ss:$16 sps:$4 sm:$0xff]  }
  0x7b   :  { %1734 = vmatpush1.bf16.msra.mxu0 %v2433_v48  ;;  %v2511_v48 = vld [vmem:[#allocation6 + $0x68] ss:$16 sps:$4 sm:$0xff]  }
  0x7c   :  { %1777 = vmatpush1.bf16.msra.mxu1 %v2436_v49  ;;  %1735 = vmatprep.subr.bf16.mxu0 %v2441_v50  ;;  %v2522_v49 = vld [vmem:[#allocation6 + $0x24c] ss:$16 sps:$4 sm:$0xff]   ;;  %v2517_v50 = vld [vmem:[#allocation6 + $0x48] ss:$16 sps:$4 sm:$0xff]  }
  0x7d   :  { %1778 = vmatprep.subr.bf16.mxu1 %v2444_v51  ;;  %v2520_v51 = vld [vmem:[#allocation6 + $0x248] ss:$16 sps:$4 sm:$0xff]  }
  0x7f   :  { %1736 = vmatpush2.bf16.msra.mxu0 %v2439_v52  ;;  %v2525_v52 = vld [vmem:[#allocation6 + $0x2c] ss:$16 sps:$4 sm:$0xff]  }
  0x80   :  { %1779 = vmatpush2.bf16.msra.mxu1 %v2442_v55  ;;  %1737 = vmatprep.subr.bf16.mxu0 %v2447_v56  ;;  %v2528_v55 = vld [vmem:[#allocation6 + $0x22c] ss:$16 sps:$4 sm:$0xff]   ;;  %v2523_v56 = vld [vmem:[#allocation6 + $0x28] ss:$16 sps:$4 sm:$0xff]  }
  0x81   :  { %1780 = vmatprep.subr.bf16.mxu1 %v2450_v57  ;;  %v2526_v57 = vld [vmem:[#allocation6 + $0x228] ss:$16 sps:$4 sm:$0xff]  }
  0x83   :  { %1738 = vmatpush2.bf16.msra.mxu0 %v2445_v58  ;;  %v2531_v58 = vld [vmem:[#allocation6 + $0xc] ss:$16 sps:$4 sm:$0xff]  }
  0x84   :  { %1781 = vmatpush2.bf16.msra.mxu1 %v2448_v59  ;;  %1739 = vmatprep.subr.bf16.mxu0 %v2453_v60  ;;  %v2534_v59 = vld [vmem:[#allocation6 + $0x20c] ss:$16 sps:$4 sm:$0xff]   ;;  %v2529_v60 = vld [vmem:[#allocation6 + $0x8] ss:$16 sps:$4 sm:$0xff]  }
  0x85   :  { %1782 = vmatprep.subr.bf16.mxu1 %v2456_v61  ;;  %v2532_v61 = vld [vmem:[#allocation6 + $0x208] ss:$16 sps:$4 sm:$0xff]  }
  0x87   :  { %1740 = vmatpush2.bf16.msra.mxu0 %v2451_v62  ;;  %v2537_v62 = vld [vmem:[#allocation6 + $0x1ec] ss:$16 sps:$4 sm:$0xff]  }
  0x88   :  { %1783 = vmatpush2.bf16.msra.mxu1 %v2454_v63  ;;  %1741 = vmatprep.subr.bf16.mxu0 %v2459_v0  ;;  %v2540_v63 = vld [vmem:[#allocation6 + $0x3ec] ss:$16 sps:$4 sm:$0xff]   ;;  %v2535_v0 = vld [vmem:[#allocation6 + $0x1e8] ss:$16 sps:$4 sm:$0xff]  }
  0x89   :  { %1784 = vmatprep.subr.bf16.mxu1 %v2462_v1  ;;  %v2538_v1 = vld [vmem:[#allocation6 + $0x3e8] ss:$16 sps:$4 sm:$0xff]  }
  0x8b   :  { %1742 = vmatpush2.bf16.msra.mxu0 %v2457_v2  ;;  %v2543_v2 = vld [vmem:[#allocation6 + $0x1cc] ss:$16 sps:$4 sm:$0xff]  }
  0x8c   :  { %1785 = vmatpush2.bf16.msra.mxu1 %v2460_v3  ;;  %1743 = vmatprep.subr.bf16.mxu0 %v2465_v4  ;;  %v2546_v3 = vld [vmem:[#allocation6 + $0x3cc] ss:$16 sps:$4 sm:$0xff]   ;;  %v2541_v4 = vld [vmem:[#allocation6 + $0x1c8] ss:$16 sps:$4 sm:$0xff]  }
  0x8d   :  { %1786 = vmatprep.subr.bf16.mxu1 %v2468_v5  ;;  %v2544_v5 = vld [vmem:[#allocation6 + $0x3c8] ss:$16 sps:$4 sm:$0xff]  }
  0x8f   :  { %1744 = vmatpush2.bf16.msra.mxu0 %v2463_v6  ;;  %v2549_v6 = vld [vmem:[#allocation6 + $0x1ac] ss:$16 sps:$4 sm:$0xff]  }
  0x90   :  { %1787 = vmatpush2.bf16.msra.mxu1 %v2466_v7  ;;  %1745 = vmatprep.subr.bf16.mxu0 %v2471_v8  ;;  %v2552_v7 = vld [vmem:[#allocation6 + $0x3ac] ss:$16 sps:$4 sm:$0xff]   ;;  %v2547_v8 = vld [vmem:[#allocation6 + $0x1a8] ss:$16 sps:$4 sm:$0xff]  }
  0x91   :  { %1788 = vmatprep.subr.bf16.mxu1 %v2474_v9  ;;  %v2550_v9 = vld [vmem:[#allocation6 + $0x3a8] ss:$16 sps:$4 sm:$0xff]  }
  0x93   :  { %1746 = vmatpush2.bf16.msra.mxu0 %v2469_v10  ;;  %v2555_v10 = vld [vmem:[#allocation6 + $0x18c] ss:$16 sps:$4 sm:$0xff]  }
  0x94   :  { %1789 = vmatpush2.bf16.msra.mxu1 %v2472_v11  ;;  %1747 = vmatprep.subr.bf16.mxu0 %v2477_v14  ;;  %v2558_v11 = vld [vmem:[#allocation6 + $0x38c] ss:$16 sps:$4 sm:$0xff]   ;;  %v2553_v14 = vld [vmem:[#allocation6 + $0x188] ss:$16 sps:$4 sm:$0xff]  }
  0x95   :  { %1790 = vmatprep.subr.bf16.mxu1 %v2480_v15  ;;  %v2556_v15 = vld [vmem:[#allocation6 + $0x388] ss:$16 sps:$4 sm:$0xff]  }
  0x97   :  { %1748 = vmatpush2.bf16.msra.mxu0 %v2475_v16  ;;  %v2561_v16 = vld [vmem:[#allocation6 + $0x16c] ss:$16 sps:$4 sm:$0xff]  }
  0x98   :  { %1791 = vmatpush2.bf16.msra.mxu1 %v2478_v17  ;;  %1749 = vmatprep.subr.bf16.mxu0 %v2483_v18  ;;  %v2564_v17 = vld [vmem:[#allocation6 + $0x36c] ss:$16 sps:$4 sm:$0xff]   ;;  %v2559_v18 = vld [vmem:[#allocation6 + $0x168] ss:$16 sps:$4 sm:$0xff]  }
  0x99   :  { %1792 = vmatprep.subr.bf16.mxu1 %v2486_v19  ;;  %v2562_v19 = vld [vmem:[#allocation6 + $0x368] ss:$16 sps:$4 sm:$0xff]  }
  0x9b   :  { %1750 = vmatpush2.bf16.msra.mxu0 %v2481_v20  ;;  %v2567_v20 = vld [vmem:[#allocation6 + $0x14c] ss:$16 sps:$4 sm:$0xff]  }
  0x9c   :  { %1793 = vmatpush2.bf16.msra.mxu1 %v2484_v21  ;;  %1805 = vmatprep.subr.bf16.mxu0 %v2489_v26  ;;  %v2570_v21 = vld [vmem:[#allocation6 + $0x34c] ss:$16 sps:$4 sm:$0xff]   ;;  %v2571_v26 = vld [vmem:[#allocation6 + $0x128] ss:$16 sps:$4 sm:$0xff]  }
  0x9d   :  { %1848 = vmatprep.subr.bf16.mxu1 %v2492_v27  ;;  %v2574_v27 = vld [vmem:[#allocation6 + $0x328] ss:$16 sps:$4 sm:$0xff]  }
  0x9e   :  { %1752 = vmatmul.mubr.bf16.vlgmr.msra.gmra.mxu0 %v2793_v28 }
  0x9f   :  { %1795 = vmatmul.mubr.bf16.vlgmr.msra.gmra.mxu1 %v2795_v29  ;;  %1806 = vmatpush1.bf16.msra.mxu0 %v2487_v30  ;;  %v2579_v30 = vld [vmem:[#allocation6 + $0x10c] ss:$16 sps:$4 sm:$0xff]  }
  0xa0   :  { %1849 = vmatpush1.bf16.msra.mxu1 %v2490_v31  ;;  %1807 = vmatprep.subr.bf16.mxu0 %v2495_v32  ;;  %v2582_v31 = vld [vmem:[#allocation6 + $0x30c] ss:$16 sps:$4 sm:$0xff]   ;;  %v2577_v32 = vld [vmem:[#allocation6 + $0x108] ss:$16 sps:$4 sm:$0xff]  }
  0xa1   :  { %1850 = vmatprep.subr.bf16.mxu1 %v2498_v33  ;;  %1837 = vmatprep.mubr.bf16.mxu0 %v2775_v53  ;;  %v2514_v53 = vld [vmem:[#allocation6 + $0x268] ss:$16 sps:$4 sm:$0xff]  }
  0xa2   :  { %1880 = vmatprep.mubr.bf16.mxu1 %v2777_v54  ;;  %v2519_v54 = vld [vmem:[#allocation6 + $0x4c] ss:$16 sps:$4 sm:$0xff]   ;;  %v2580_v33 = vld [vmem:[#allocation6 + $0x308] ss:$16 sps:$4 sm:$0xff]  }
  0xa3   :  { %1808 = vmatpush1.bf16.msra.mxu0 %v2493_v34  ;;  %v2585_v34 = vld [vmem:[#allocation6 + $0x4ec] ss:$16 sps:$4 sm:$0xff]  }
  0xa4   :  { %1851 = vmatpush1.bf16.msra.mxu1 %v2496_v35  ;;  %1809 = vmatprep.subr.bf16.mxu0 %v2501_v36  ;;  %v2588_v35 = vld [vmem:[#allocation6 + $0x6ec] ss:$16 sps:$4 sm:$0xff]   ;;  %v2583_v36 = vld [vmem:[#allocation6 + $0x4e8] ss:$16 sps:$4 sm:$0xff]  }
  0xa5   :  { %1852 = vmatprep.subr.bf16.mxu1 %v2504_v37  ;;  %v2586_v37 = vld [vmem:[#allocation6 + $0x6e8] ss:$16 sps:$4 sm:$0xff]  }
  0xa7   :  { %1810 = vmatpush1.bf16.msra.mxu0 %v2499_v38  ;;  %v2591_v38 = vld [vmem:[#allocation6 + $0x4cc] ss:$16 sps:$4 sm:$0xff]  }
  0xa8   :  { %1853 = vmatpush1.bf16.msra.mxu1 %v2502_v39  ;;  %1811 = vmatprep.subr.bf16.mxu0 %v2507_v40  ;;  %v2594_v39 = vld [vmem:[#allocation6 + $0x6cc] ss:$16 sps:$4 sm:$0xff]   ;;  %v2589_v40 = vld [vmem:[#allocation6 + $0x4c8] ss:$16 sps:$4 sm:$0xff]  }
  0xa9   :  { %1854 = vmatprep.subr.bf16.mxu1 %v2510_v41  ;;  %v2592_v41 = vld [vmem:[#allocation6 + $0x6c8] ss:$16 sps:$4 sm:$0xff]  }
  0xab   :  { %1812 = vmatpush1.bf16.msra.mxu0 %v2505_v42  ;;  %v2597_v42 = vld [vmem:[#allocation6 + $0x4ac] ss:$16 sps:$4 sm:$0xff]  }
  0xac   :  { %1855 = vmatpush1.bf16.msra.mxu1 %v2508_v43  ;;  %1813 = vmatprep.subr.bf16.mxu0 %v2513_v44  ;;  %v2600_v43 = vld [vmem:[#allocation6 + $0x6ac] ss:$16 sps:$4 sm:$0xff]   ;;  %v2595_v44 = vld [vmem:[#allocation6 + $0x4a8] ss:$16 sps:$4 sm:$0xff]  }
  0xad   :  { %1856 = vmatprep.subr.bf16.mxu1 %v2516_v46  ;;  %v2598_v46 = vld [vmem:[#allocation6 + $0x6a8] ss:$16 sps:$4 sm:$0xff]  }
  0xaf   :  { %1814 = vmatpush1.bf16.msra.mxu0 %v2511_v48  ;;  %v2601_v48 = vld [vmem:[#allocation6 + $0x488] ss:$16 sps:$4 sm:$0xff]  }
  0xb0   :  { %1857 = vmatpush1.bf16.msra.mxu1 %v2514_v53  ;;  %1815 = vmatprep.subr.bf16.mxu0 %v2519_v54  ;;  %v2604_v53 = vld [vmem:[#allocation6 + $0x688] ss:$16 sps:$4 sm:$0xff]   ;;  %v2609_v54 = vld [vmem:[#allocation6 + $0x46c] ss:$16 sps:$4 sm:$0xff]  }
  0xb1   :  { %1858 = vmatprep.subr.bf16.mxu1 %v2522_v49  ;;  %v2612_v49 = vld [vmem:[#allocation6 + $0x66c] ss:$16 sps:$4 sm:$0xff]  }
  0xb3   :  { %1816 = vmatpush1.bf16.msra.mxu0 %v2517_v50  ;;  %v2615_v50 = vld [vmem:[#allocation6 + $0x44c] ss:$16 sps:$4 sm:$0xff]  }
  0xb4   :  { %1859 = vmatpush1.bf16.msra.mxu1 %v2520_v51  ;;  %1817 = vmatprep.subr.bf16.mxu0 %v2525_v52  ;;  %v2618_v51 = vld [vmem:[#allocation6 + $0x64c] ss:$16 sps:$4 sm:$0xff]   ;;  %v2613_v52 = vld [vmem:[#allocation6 + $0x448] ss:$16 sps:$4 sm:$0xff]  }
  0xb5   :  { %1860 = vmatprep.subr.bf16.mxu1 %v2528_v55  ;;  %v2616_v55 = vld [vmem:[#allocation6 + $0x648] ss:$16 sps:$4 sm:$0xff]  }
  0xb7   :  { %1818 = vmatpush1.bf16.msra.mxu0 %v2523_v56  ;;  %v2621_v56 = vld [vmem:[#allocation6 + $0x42c] ss:$16 sps:$4 sm:$0xff]  }
  0xb8   :  { %1861 = vmatpush1.bf16.msra.mxu1 %v2526_v57  ;;  %1819 = vmatprep.subr.bf16.mxu0 %v2531_v58  ;;  %v2624_v57 = vld [vmem:[#allocation6 + $0x62c] ss:$16 sps:$4 sm:$0xff]   ;;  %v2619_v58 = vld [vmem:[#allocation6 + $0x428] ss:$16 sps:$4 sm:$0xff]  }
  0xb9   :  { %1862 = vmatprep.subr.bf16.mxu1 %v2534_v59  ;;  %v2622_v59 = vld [vmem:[#allocation6 + $0x628] ss:$16 sps:$4 sm:$0xff]  }
  0xbb   :  { %1820 = vmatpush1.bf16.msra.mxu0 %v2529_v60  ;;  %v2627_v60 = vld [vmem:[#allocation6 + $0x40c] ss:$16 sps:$4 sm:$0xff]  }
  0xbc   :  { %1863 = vmatpush1.bf16.msra.mxu1 %v2532_v61  ;;  %1821 = vmatprep.subr.bf16.mxu0 %v2537_v62  ;;  %v2630_v61 = vld [vmem:[#allocation6 + $0x60c] ss:$16 sps:$4 sm:$0xff]   ;;  %v2625_v62 = vld [vmem:[#allocation6 + $0x408] ss:$16 sps:$4 sm:$0xff]  }
  0xbd   :  { %1864 = vmatprep.subr.bf16.mxu1 %v2540_v63  ;;  %v2628_v63 = vld [vmem:[#allocation6 + $0x608] ss:$16 sps:$4 sm:$0xff]  }
  0xbf   :  { %1822 = vmatpush2.bf16.msra.mxu0 %v2535_v0  ;;  %v2633_v0 = vld [vmem:[#allocation6 + $0x5ec] ss:$16 sps:$4 sm:$0xff]  }
  0xc0   :  { %1865 = vmatpush2.bf16.msra.mxu1 %v2538_v1  ;;  %1823 = vmatprep.subr.bf16.mxu0 %v2543_v2  ;;  %v2636_v1 = vld [vmem:[#allocation6 + $0x7ec] ss:$16 sps:$4 sm:$0xff]   ;;  %v2631_v2 = vld [vmem:[#allocation6 + $0x5e8] ss:$16 sps:$4 sm:$0xff]  }
  0xc1   :  { %1866 = vmatprep.subr.bf16.mxu1 %v2546_v3  ;;  %v2634_v3 = vld [vmem:[#allocation6 + $0x7e8] ss:$16 sps:$4 sm:$0xff]  }
  0xc3   :  { %1824 = vmatpush2.bf16.msra.mxu0 %v2541_v4  ;;  %v2639_v4 = vld [vmem:[#allocation6 + $0x5cc] ss:$16 sps:$4 sm:$0xff]  }
  0xc4   :  { %1867 = vmatpush2.bf16.msra.mxu1 %v2544_v5  ;;  %1825 = vmatprep.subr.bf16.mxu0 %v2549_v6  ;;  %v2642_v5 = vld [vmem:[#allocation6 + $0x7cc] ss:$16 sps:$4 sm:$0xff]   ;;  %v2637_v6 = vld [vmem:[#allocation6 + $0x5c8] ss:$16 sps:$4 sm:$0xff]  }
  0xc5   :  { %1868 = vmatprep.subr.bf16.mxu1 %v2552_v7  ;;  %v2640_v7 = vld [vmem:[#allocation6 + $0x7c8] ss:$16 sps:$4 sm:$0xff]  }
  0xc7   :  { %1826 = vmatpush2.bf16.msra.mxu0 %v2547_v8  ;;  %v2645_v8 = vld [vmem:[#allocation6 + $0x5ac] ss:$16 sps:$4 sm:$0xff]  }
  0xc8   :  { %1869 = vmatpush2.bf16.msra.mxu1 %v2550_v9  ;;  %1827 = vmatprep.subr.bf16.mxu0 %v2555_v10  ;;  %v2648_v9 = vld [vmem:[#allocation6 + $0x7ac] ss:$16 sps:$4 sm:$0xff]   ;;  %v2643_v10 = vld [vmem:[#allocation6 + $0x5a8] ss:$16 sps:$4 sm:$0xff]  }
  0xc9   :  { %1870 = vmatprep.subr.bf16.mxu1 %v2558_v11  ;;  %v2646_v11 = vld [vmem:[#allocation6 + $0x7a8] ss:$16 sps:$4 sm:$0xff]  }
  0xcb   :  { %1828 = vmatpush2.bf16.msra.mxu0 %v2553_v14  ;;  %v2651_v14 = vld [vmem:[#allocation6 + $0x58c] ss:$16 sps:$4 sm:$0xff]  }
  0xcc   :  { %1871 = vmatpush2.bf16.msra.mxu1 %v2556_v15  ;;  %1829 = vmatprep.subr.bf16.mxu0 %v2561_v16  ;;  %v2654_v15 = vld [vmem:[#allocation6 + $0x78c] ss:$16 sps:$4 sm:$0xff]   ;;  %v2649_v16 = vld [vmem:[#allocation6 + $0x588] ss:$16 sps:$4 sm:$0xff]  }
  0xcd   :  { %1872 = vmatprep.subr.bf16.mxu1 %v2564_v17  ;;  %v2652_v17 = vld [vmem:[#allocation6 + $0x788] ss:$16 sps:$4 sm:$0xff]  }
  0xcf   :  { %1830 = vmatpush2.bf16.msra.mxu0 %v2559_v18  ;;  %v2657_v18 = vld [vmem:[#allocation6 + $0x56c] ss:$16 sps:$4 sm:$0xff]  }
  0xd0   :  { %1873 = vmatpush2.bf16.msra.mxu1 %v2562_v19  ;;  %1831 = vmatprep.subr.bf16.mxu0 %v2567_v20  ;;  %v2660_v19 = vld [vmem:[#allocation6 + $0x76c] ss:$16 sps:$4 sm:$0xff]   ;;  %v2655_v20 = vld [vmem:[#allocation6 + $0x568] ss:$16 sps:$4 sm:$0xff]  }
  0xd1   :  { %1874 = vmatprep.subr.bf16.mxu1 %v2570_v21  ;;  %v2658_v21 = vld [vmem:[#allocation6 + $0x768] ss:$16 sps:$4 sm:$0xff]  }
  0xd3   :  { %1832 = vmatpush2.bf16.msra.mxu0 %v2565_v22  ;;  %v2663_v22 = vld [vmem:[#allocation6 + $0x54c] ss:$16 sps:$4 sm:$0xff]  }
  0xd4   :  { %1875 = vmatpush2.bf16.msra.mxu1 %v2568_v23  ;;  %1833 = vmatprep.subr.bf16.mxu0 %v2573_v24  ;;  %v2666_v23 = vld [vmem:[#allocation6 + $0x74c] ss:$16 sps:$4 sm:$0xff]   ;;  %v2661_v24 = vld [vmem:[#allocation6 + $0x548] ss:$16 sps:$4 sm:$0xff]  }
  0xd5   :  { %1876 = vmatprep.subr.bf16.mxu1 %v2576_v25  ;;  %v2664_v25 = vld [vmem:[#allocation6 + $0x748] ss:$16 sps:$4 sm:$0xff]  }
  0xd7   :  { %1834 = vmatpush2.bf16.msra.mxu0 %v2571_v26  ;;  %v2669_v26 = vld [vmem:[#allocation6 + $0x52c] ss:$16 sps:$4 sm:$0xff]  }
  0xd8   :  { %1877 = vmatpush2.bf16.msra.mxu1 %v2574_v27  ;;  %1835 = vmatprep.subr.bf16.mxu0 %v2579_v30  ;;  %v2672_v27 = vld [vmem:[#allocation6 + $0x72c] ss:$16 sps:$4 sm:$0xff]   ;;  %v2667_v30 = vld [vmem:[#allocation6 + $0x528] ss:$16 sps:$4 sm:$0xff]  }
  0xd9   :  { %1878 = vmatprep.subr.bf16.mxu1 %v2582_v31  ;;  %v2670_v31 = vld [vmem:[#allocation6 + $0x728] ss:$16 sps:$4 sm:$0xff]  }
  0xdb   :  { %1836 = vmatpush2.bf16.msra.mxu0 %v2577_v32  ;;  %v2675_v32 = vld [vmem:[#allocation6 + $0x50c] ss:$16 sps:$4 sm:$0xff]  }
  0xdc   :  { %1879 = vmatpush2.bf16.msra.mxu1 %v2580_v33  ;;  %1891 = vmatprep.subr.bf16.mxu0 %v2585_v34  ;;  %v2678_v33 = vld [vmem:[#allocation6 + $0x70c] ss:$16 sps:$4 sm:$0xff]   ;;  %v2673_v34 = vld [vmem:[#allocation6 + $0x508] ss:$16 sps:$4 sm:$0xff]  }
  0xdd   :  { %1934 = vmatprep.subr.bf16.mxu1 %v2588_v35  ;;  %v2676_v35 = vld [vmem:[#allocation6 + $0x708] ss:$16 sps:$4 sm:$0xff]  }
  0xde   :  { %1838 = vmatmul.mubr.bf16.vlgmr.msra.gmra.mxu0 %v2781_v12  ;;  %v2603_v12 = vld [vmem:[#allocation6 + $0x48c] ss:$16 sps:$4 sm:$0xff]  }
  0xdf   :  { %1881 = vmatmul.mubr.bf16.vlgmr.msra.gmra.mxu1 %v2783_v13  ;;  %1892 = vmatpush1.bf16.msra.mxu0 %v2583_v36  ;;  %v2606_v13 = vld [vmem:[#allocation6 + $0x68c] ss:$16 sps:$4 sm:$0xff]  }
  0xe0   :  { %1935 = vmatpush1.bf16.msra.mxu1 %v2586_v37  ;;  %1893 = vmatprep.subr.bf16.mxu0 %v2591_v38 }
  0xe1   :  { %1936 = vmatprep.subr.bf16.mxu1 %v2594_v39  ;;  %1923 = vmatprep.mubr.bf16.mxu0 %v2787_v45  ;;  %v2607_v45 = vld [vmem:[#allocation6 + $0x468] ss:$16 sps:$4 sm:$0xff]  }
  0xe2   :  { %1966 = vmatprep.mubr.bf16.mxu1 %v2789_v47  ;;  %v2610_v47 = vld [vmem:[#allocation6 + $0x668] ss:$16 sps:$4 sm:$0xff]  }
  0xe3   :  { %1894 = vmatpush1.bf16.msra.mxu0 %v2589_v40 }
  0xe4   :  { %1937 = vmatpush1.bf16.msra.mxu1 %v2592_v41  ;;  %1895 = vmatprep.subr.bf16.mxu0 %v2597_v42 }
  0xe5   :  { %1938 = vmatprep.subr.bf16.mxu1 %v2600_v43 }
  0xe7   :  { %1896 = vmatpush1.bf16.msra.mxu0 %v2595_v44 }
  0xe8   :  { %1939 = vmatpush1.bf16.msra.mxu1 %v2598_v46  ;;  %1897 = vmatprep.subr.bf16.mxu0 %v2603_v12 }
  0xe9   :  { %1940 = vmatprep.subr.bf16.mxu1 %v2606_v13 }
  0xeb   :  { %1898 = vmatpush1.bf16.msra.mxu0 %v2601_v48 }
  0xec   :  { %1941 = vmatpush1.bf16.msra.mxu1 %v2604_v53  ;;  %1899 = vmatprep.subr.bf16.mxu0 %v2609_v54 }
  0xed   :  { %1942 = vmatprep.subr.bf16.mxu1 %v2612_v49 }
  0xef   :  { %1900 = vmatpush1.bf16.msra.mxu0 %v2607_v45 }
  0xf0   :  { %1943 = vmatpush1.bf16.msra.mxu1 %v2610_v47  ;;  %1901 = vmatprep.subr.bf16.mxu0 %v2615_v50 }
  0xf1   :  { %1944 = vmatprep.subr.bf16.mxu1 %v2618_v51 }
  0xf3   :  { %1902 = vmatpush1.bf16.msra.mxu0 %v2613_v52 }
  0xf4   :  { %1945 = vmatpush1.bf16.msra.mxu1 %v2616_v55  ;;  %1903 = vmatprep.subr.bf16.mxu0 %v2621_v56 }
  0xf5   :  { %1946 = vmatprep.subr.bf16.mxu1 %v2624_v57 }
  0xf7   :  { %1904 = vmatpush1.bf16.msra.mxu0 %v2619_v58 }
  0xf8   :  { %1947 = vmatpush1.bf16.msra.mxu1 %v2622_v59  ;;  %1905 = vmatprep.subr.bf16.mxu0 %v2627_v60 }
  0xf9   :  { %1948 = vmatprep.subr.bf16.mxu1 %v2630_v61 }
  0xfb   :  { %1906 = vmatpush1.bf16.msra.mxu0 %v2625_v62 }
  0xfc   :  { %1949 = vmatpush1.bf16.msra.mxu1 %v2628_v63  ;;  %1907 = vmatprep.subr.bf16.mxu0 %v2633_v0 }
  0xfd   :  { %1950 = vmatprep.subr.bf16.mxu1 %v2636_v1 }
  0xff   :  { %1908 = vmatpush2.bf16.msra.mxu0 %v2631_v2 }
 0x100   :  { %1951 = vmatpush2.bf16.msra.mxu1 %v2634_v3  ;;  %1909 = vmatprep.subr.bf16.mxu0 %v2639_v4 }
 0x101   :  { %1952 = vmatprep.subr.bf16.mxu1 %v2642_v5 }
 0x103   :  { %1910 = vmatpush2.bf16.msra.mxu0 %v2637_v6 }
 0x104   :  { %1953 = vmatpush2.bf16.msra.mxu1 %v2640_v7  ;;  %1911 = vmatprep.subr.bf16.mxu0 %v2645_v8 }
 0x105   :  { %1954 = vmatprep.subr.bf16.mxu1 %v2648_v9 }
 0x107   :  { %1912 = vmatpush2.bf16.msra.mxu0 %v2643_v10 }
 0x108   :  { %1955 = vmatpush2.bf16.msra.mxu1 %v2646_v11  ;;  %1913 = vmatprep.subr.bf16.mxu0 %v2651_v14 }
 0x109   :  { %1956 = vmatprep.subr.bf16.mxu1 %v2654_v15 }
 0x10b   :  { %1914 = vmatpush2.bf16.msra.mxu0 %v2649_v16 }
 0x10c   :  { %1957 = vmatpush2.bf16.msra.mxu1 %v2652_v17  ;;  %1915 = vmatprep.subr.bf16.mxu0 %v2657_v18 }
 0x10d   :  { %1958 = vmatprep.subr.bf16.mxu1 %v2660_v19 }
 0x10f   :  { %1916 = vmatpush2.bf16.msra.mxu0 %v2655_v20 }
 0x110   :  { %1959 = vmatpush2.bf16.msra.mxu1 %v2658_v21  ;;  %1917 = vmatprep.subr.bf16.mxu0 %v2663_v22 }
 0x111   :  { %1960 = vmatprep.subr.bf16.mxu1 %v2666_v23 }
 0x113   :  { %1918 = vmatpush2.bf16.msra.mxu0 %v2661_v24 }
 0x114   :  { %1961 = vmatpush2.bf16.msra.mxu1 %v2664_v25  ;;  %1919 = vmatprep.subr.bf16.mxu0 %v2669_v26 }
 0x115   :  { %1962 = vmatprep.subr.bf16.mxu1 %v2672_v27 }
 0x117   :  { %1920 = vmatpush2.bf16.msra.mxu0 %v2667_v30 }
 0x118   :  { %1963 = vmatpush2.bf16.msra.mxu1 %v2670_v31  ;;  %1921 = vmatprep.subr.bf16.mxu0 %v2675_v32 }
 0x119   :  { %1964 = vmatprep.subr.bf16.mxu1 %v2678_v33 }
 0x11b   :  { %1922 = vmatpush2.bf16.msra.mxu0 %v2673_v34 }
 0x11c   :  { %1965 = vmatpush2.bf16.msra.mxu1 %v2676_v35 }
 0x11e   :  { %1924 = vmatmul.mubr.bf16.vlgmr.msra.gmra.mxu0 %v2793_v28  ;;  %v1667_v36 = vpop.f32.mrf.mxu0 }
 0x11f   :  { %1967 = vmatmul.mubr.bf16.vlgmr.msra.gmra.mxu1 %v2795_v29  ;;  %v1710_v37 = vpop.f32.mrf.mxu1 }
 0x120   :  { %v1669_v38 = vpop.f32.mrf.mxu0  ;;  %v1711_v44 = vadd.f32 %v1710_v37, %v1667_v36 }
 0x121   :  { %v1712_v39 = vpop.f32.mrf.mxu1 }
 0x122   :  { %v1671_v40 = vpop.f32.mrf.mxu0  ;;  %v1713_v13 = vadd.f32 %v1712_v39, %v1669_v38 }
 0x123   :  { %v1714_v41 = vpop.f32.mrf.mxu1 }
 0x124   :  { %v1673_v42 = vpop.f32.mrf.mxu0  ;;  %v1715_v49 = vadd.f32 %v1714_v41, %v1671_v40 }
 0x125   :  { %v1716_v43 = vpop.f32.mrf.mxu1 }
 0x126   :  { %v1717_v50 = vadd.f32 %v1716_v43, %v1673_v42 }
 0x15e   :  { %v1753_v46 = vpop.f32.mrf.mxu0 }
 0x15f   :  { %v1796_v12 = vpop.f32.mrf.mxu1  ;;  %v1754_v48 = vadd.f32 %v1753_v46, %v1711_v44 }
 0x160   :  { %v1755_v53 = vpop.f32.mrf.mxu0 }
 0x161   :  { %v1798_v54 = vpop.f32.mrf.mxu1  ;;  %v1797_v45 = vadd.f32 %v1796_v12, %v1754_v48  ;;  %v1756_v28 = vadd.f32 %v1755_v53, %v1713_v13 }
 0x162   :  { %v1757_v47 = vpop.f32.mrf.mxu0 }
 0x163   :  { %v1800_v29 = vpop.f32.mrf.mxu1  ;;  %2004 = vst [vmem:[#allocation8] sm:$0xff] %v1797_v45  ;;  %v1799_v51 = vadd.f32 %v1798_v54, %v1756_v28  ;;  %v1758_v52 = vadd.f32 %v1757_v47, %v1715_v49 }
 0x164   :  { %v1759_v55 = vpop.f32.mrf.mxu0 }
 0x165   :  { %2005 = vst [vmem:[#allocation8 + $0x8] sm:$0xff] %v1799_v51  ;;  %v1801_v56 = vadd.f32 %v1800_v29, %v1758_v52  ;;  %v1760_v57 = vadd.f32 %v1759_v55, %v1717_v50  ;;  %v1802_v58 = vpop.f32.mrf.mxu1 }
 0x167   :  { %2008 = vst [vmem:[#allocation8 + $0x20] sm:$0xff] %v1801_v56  ;;  %v1803_v59 = vadd.f32 %v1802_v58, %v1760_v57 }
 0x169   :  { %2009 = vst [vmem:[#allocation8 + $0x28] sm:$0xff] %v1803_v59 }
 0x19e   :  { %v1839_v60 = vpop.f32.mrf.mxu0 }
 0x19f   :  { %v1882_v61 = vpop.f32.mrf.mxu1 }
 0x1a0   :  { %v1841_v62 = vpop.f32.mrf.mxu0  ;;  %v1883_v4 = vadd.f32 %v1882_v61, %v1839_v60 }
 0x1a1   :  { %v1884_v63 = vpop.f32.mrf.mxu1 }
 0x1a2   :  { %v1843_v0 = vpop.f32.mrf.mxu0  ;;  %v1885_v7 = vadd.f32 %v1884_v63, %v1841_v62 }
 0x1a3   :  { %v1886_v1 = vpop.f32.mrf.mxu1 }
 0x1a4   :  { %v1845_v2 = vpop.f32.mrf.mxu0  ;;  %v1887_v11 = vadd.f32 %v1886_v1, %v1843_v0 }
 0x1a5   :  { %v1888_v3 = vpop.f32.mrf.mxu1 }
 0x1a6   :  { %v1889_v18 = vadd.f32 %v1888_v3, %v1845_v2 }
 0x1de   :  { %v1925_v5 = vpop.f32.mrf.mxu0 }
 0x1df   :  { %v1968_v6 = vpop.f32.mrf.mxu1  ;;  %v1926_v8 = vadd.f32 %v1925_v5, %v1883_v4 }
 0x1e0   :  { %v1927_v9 = vpop.f32.mrf.mxu0 }
 0x1e1   :  { %v1970_v10 = vpop.f32.mrf.mxu1  ;;  %v1969_v14 = vadd.f32 %v1968_v6, %v1926_v8  ;;  %v1928_v15 = vadd.f32 %v1927_v9, %v1885_v7 }
 0x1e2   :  { %v1929_v16 = vpop.f32.mrf.mxu0 }
 0x1e3   :  { %v1972_v17 = vpop.f32.mrf.mxu1  ;;  %2006 = vst [vmem:[#allocation8 + $0x10] sm:$0xff] %v1969_v14  ;;  %v1971_v19 = vadd.f32 %v1970_v10, %v1928_v15  ;;  %v1930_v20 = vadd.f32 %v1929_v16, %v1887_v11 }
 0x1e4   :  { %v1931_v21 = vpop.f32.mrf.mxu0 }
 0x1e5   :  { %2007 = vst [vmem:[#allocation8 + $0x18] sm:$0xff] %v1971_v19  ;;  %v1973_v22 = vadd.f32 %v1972_v17, %v1930_v20  ;;  %v1932_v23 = vadd.f32 %v1931_v21, %v1889_v18  ;;  %v1974_v24 = vpop.f32.mrf.mxu1 }
 0x1e7   :  { %2010 = vst [vmem:[#allocation8 + $0x30] sm:$0xff] %v1973_v22  ;;  %v1975_v25 = vadd.f32 %v1974_v24, %v1932_v23 }
 0x1e9   :  { %2011 = vst [vmem:[#allocation8 + $0x38] sm:$0xff] %v1975_v25 }
 0x1ea   :  { %2730 = shalt.err (!%p2727_p0)
}
 0x1eb   :  { %s2752_s24 = smov 512   ;;  %s2753_s25 = smov 32  }
 0x1ec   :  { %2023 = dma.vmem_to_hbm [thread:$0]  %s2018_s1, 1024, %s2812_s2, [#allocation5], %s2752_s24, %s2752_s24, %s2753_s25  }
 0x1ed   :  { %2743 = dma.done.wait [#allocation5], 1024  }
 0x1ee   :  { %2744 = vsyncadd [#allocation5], 4294966272 }
 0x1ef   :  { %2027 = vsyncpa [#allocation4], 1 }
 0x1f0   :  { %2028 = vsyncpa [#allocation7], 1 }
 0x1f1   :  { %2029 = vsyncpa [#allocation5], 1 }

</bundles_post_ra>
